<compile_context>
chip_gen: v7x
topology: tpu7x:2x2x1
jax: 0.10.0
libtpu: 0.0.40
codegen_flags: <defaults>
</compile_context>

<pallas_src>
import math

import jax
import jax.numpy as jnp
from jax.experimental import pallas as pl
from jax.experimental.pallas import tpu as pltpu

_LANE = 128
_SUBLANE = 8


def _round_up(n, m):
    return ((n + m - 1) // m) * m


def mlp_kernel(x_ref, t_ref, sel_ref,
               w1x_ref, w1t_ref, b1_ref,
               w2_ref, b2_ref, w3_ref, b3_ref, w4_ref, b4_ref,
               o_ref):
    """One batch tile of the fused MLP.

    x_ref  : (TB, 3d)   streamed activation tile
    t_ref  : (TB, 1)    streamed time tile
    sel_ref: (3d, DP)   constant 0/1 selector routing x[:, 2d:3d] into the
                        first d lanes of a lane-dense (TB, DP) mask
    w*/b*  : VMEM-resident, zero-padded weights (constant index_map)
    o_ref  : (TB, DP)   lane-dense padded output tile
    """
    x = x_ref[...]
    t = t_ref[...]

    # Layer 1: x @ W1[:3d] + t * W1[3d] + b1  (== concat([x, t]) @ W1 + b1)
    h = jnp.dot(x, w1x_ref[...], preferred_element_type=jnp.float32)
    h = h + t * w1t_ref[...] + b1_ref[...]
    h = h * jax.nn.sigmoid(h)                                   # SiLU

    h = jnp.dot(h, w2_ref[...], preferred_element_type=jnp.float32) + b2_ref[...]
    h = h * jax.nn.sigmoid(h)                                   # SiLU

    h = jnp.dot(h, w3_ref[...], preferred_element_type=jnp.float32) + b3_ref[...]
    h = h * jax.nn.sigmoid(h)                                   # SiLU

    out = jnp.dot(h, w4_ref[...], preferred_element_type=jnp.float32) + b4_ref[...]

    # (1 - m) * out, kept lane-dense: m_full[:, j] = x[:, 2d + j] for j < d,
    # 0 elsewhere (padded out columns are exactly 0, so extra lanes are inert).
    m_full = jnp.dot(x, sel_ref[...], preferred_element_type=jnp.float32)
    o_ref[...] = (1.0 - m_full) * out


def init_params(key, d, hidden_dims):
    """Deterministic nn.Linear-style init; weights stored as (in, out)."""
    input_dim = 3 * d + 1
    dims = [input_dim] + list(hidden_dims) + [d]
    params = []
    for i in range(len(dims) - 1):
        fan_in, fan_out = dims[i], dims[i + 1]
        key, kw, kb = jax.random.split(key, 3)
        bound = 1.0 / math.sqrt(fan_in)
        w = jax.random.uniform(kw, (fan_in, fan_out), jnp.float32, -bound, bound)
        b = jax.random.uniform(kb, (1, fan_out), jnp.float32, -bound, bound)
        params.append((w, b))
    return params


def _pad2(a, rows, cols):
    return jnp.pad(a, ((0, rows - a.shape[0]), (0, cols - a.shape[1])))


def mlp_forward(x, t, params, d, *, tile_b=512):
    """Pallas implementation of MLP.forward(x, t)."""
    B, Dx = x.shape
    assert Dx == 3 * d and t.shape == (B, 1)
    (w1, b1), (w2, b2), (w3, b3), (w4, b4) = params

    # ---- lane-pad feature dims (zero rows/cols keep semantics exact) ----
    H1 = _round_up(w1.shape[1], _LANE)
    H2 = _round_up(w2.shape[1], _LANE)
    H3 = _round_up(w3.shape[1], _LANE)
    DP = _round_up(d, _LANE)

    w1x = _pad2(w1[:Dx, :], Dx, H1)      # rows of W1 that multiply x
    w1t = _pad2(w1[Dx:, :], 1, H1)       # row of W1 that multiplies t
    b1p = _pad2(b1, 1, H1)
    w2p = _pad2(w2, H1, H2)
    b2p = _pad2(b2, 1, H2)
    w3p = _pad2(w3, H2, H3)
    b3p = _pad2(b3, 1, H3)
    w4p = _pad2(w4, H3, DP)
    b4p = _pad2(b4, 1, DP)

    # 0/1 selector: routes x[:, 2d:3d] into lanes [0, d) of a DP-wide tile.
    sel = jnp.zeros((Dx, DP), jnp.float32).at[
        jnp.arange(2 * d, 3 * d), jnp.arange(d)].set(1.0)

    # ---- batch tiling ----
    tb = _round_up(min(tile_b, _round_up(B, _SUBLANE)), _SUBLANE)
    B_pad = _round_up(B, tb)
    if B_pad != B:
        x = jnp.pad(x, ((0, B_pad - B), (0, 0)))
        t = jnp.pad(t, ((0, B_pad - B), (0, 0)))
    grid = (B_pad // tb,)

    def batch_spec(cols):
        return pl.BlockSpec((tb, cols), lambda i: (i, 0))

    def const_spec(shape):
        return pl.BlockSpec(shape, lambda i: (0, 0))

    # Rough VMEM budget: weights (x2 buffers) + streamed tiles + activations.
    w_bytes = 4 * sum(a.size for a in
                      (sel, w1x, w1t, b1p, w2p, b2p, w3p, b3p, w4p, b4p))
    io_bytes = 4 * 2 * tb * (Dx + 1 + DP)
    act_bytes = 4 * 4 * tb * max(H1, H2, H3, DP)
    vmem_limit = int(min(max(2 * w_bytes + io_bytes + act_bytes, 32 * 2**20),
                         56 * 2**20))

    out_pad = pl.pallas_call(
        mlp_kernel,
        out_shape=jax.ShapeDtypeStruct((B_pad, DP), jnp.float32),
        grid=grid,
        in_specs=[
            batch_spec(Dx),            # x
            batch_spec(1),             # t
            const_spec((Dx, DP)),      # sel
            const_spec((Dx, H1)),      # w1x
            const_spec((1, H1)),       # w1t
            const_spec((1, H1)),       # b1
            const_spec((H1, H2)),      # w2
            const_spec((1, H2)),       # b2
            const_spec((H2, H3)),      # w3
            const_spec((1, H3)),       # b3
            const_spec((H3, DP)),      # w4
            const_spec((1, DP)),       # b4
        ],
        out_specs=batch_spec(DP),
        compiler_params=pltpu.CompilerParams(
            dimension_semantics=("parallel",),
            vmem_limit_bytes=vmem_limit),
    )(x, t, sel, w1x, w1t, b1p, w2p, b2p, w3p, b3p, w4p, b4p)

    return out_pad[:B, :d]


def mlp_reference(x, t, params, d):
    """Pure-JAX reference for correctness check."""
    m = x[:, -d:]
    h = jnp.concatenate([x, t], axis=1)
    (w1, b1), (w2, b2), (w3, b3), (w4, b4) = params
    h = h @ w1 + b1
    h = h * jax.nn.sigmoid(h)
    h = h @ w2 + b2
    h = h * jax.nn.sigmoid(h)
    h = h @ w3 + b3
    h = h * jax.nn.sigmoid(h)
    out = h @ w4 + b4
    return (1.0 - m) * out


if __name__ == "__main__":
    d = 8
    hidden_dims = [32, 32, 32]     # SMALL test shapes (PyTorch default: 1001)
    B = 2

    key = jax.random.PRNGKey(0)
    kx, kt, kp = jax.random.split(key, 3)

    x = jax.random.normal(kx, (B, 3 * d), dtype=jnp.float32)
    t = jax.random.uniform(kt, (B, 1), dtype=jnp.float32)
    params = init_params(kp, d, hidden_dims)

    out = mlp_forward(x, t, params, d)
    out = jax.block_until_ready(out)

    ref = mlp_reference(x, t, params, d)
    assert out.shape == (B, d)
    assert jnp.allclose(out, ref, atol=1e-5, rtol=1e-5), "mismatch vs reference"

    print("KERNEL_OK")
</pallas_src>

<mosaic_0001>
module attributes {stable_mosaic.version = 11 : i64} {
  func.func @mlp_kernel(%arg0: i32, %arg1: memref<8x24xf32, #tpu.memory_space<vmem>>, %arg2: memref<8x1xf32, #tpu.memory_space<vmem>>, %arg3: memref<24x128xf32, #tpu.memory_space<vmem>>, %arg4: memref<24x128xf32, #tpu.memory_space<vmem>>, %arg5: memref<1x128xf32, #tpu.memory_space<vmem>>, %arg6: memref<1x128xf32, #tpu.memory_space<vmem>>, %arg7: memref<128x128xf32, #tpu.memory_space<vmem>>, %arg8: memref<1x128xf32, #tpu.memory_space<vmem>>, %arg9: memref<128x128xf32, #tpu.memory_space<vmem>>, %arg10: memref<1x128xf32, #tpu.memory_space<vmem>>, %arg11: memref<128x128xf32, #tpu.memory_space<vmem>>, %arg12: memref<1x128xf32, #tpu.memory_space<vmem>>, %arg13: memref<8x128xf32, #tpu.memory_space<vmem>>) attributes {dimension_semantics = [#tpu.dimension_semantics<parallel>], iteration_bounds = array<i64: 1>, scalar_prefetch = 0 : i64, scratch_operands = 0 : i64, tpu.core_type = #tpu.core_type<tc>, window_params = [{transform_indices = @transform_0, window_bounds = array<i64: 8, 24>}, {transform_indices = @transform_1, window_bounds = array<i64: 8, 1>}, {pipeline_mode = #tpu.pipeline_mode<synchronous>, transform_indices = @transform_2, window_bounds = array<i64: 24, 128>}, {pipeline_mode = #tpu.pipeline_mode<synchronous>, transform_indices = @transform_3, window_bounds = array<i64: 24, 128>}, {pipeline_mode = #tpu.pipeline_mode<synchronous>, transform_indices = @transform_4, window_bounds = array<i64: 1, 128>}, {pipeline_mode = #tpu.pipeline_mode<synchronous>, transform_indices = @transform_5, window_bounds = array<i64: 1, 128>}, {pipeline_mode = #tpu.pipeline_mode<synchronous>, transform_indices = @transform_6, window_bounds = array<i64: 128, 128>}, {pipeline_mode = #tpu.pipeline_mode<synchronous>, transform_indices = @transform_7, window_bounds = array<i64: 1, 128>}, {pipeline_mode = #tpu.pipeline_mode<synchronous>, transform_indices = @transform_8, window_bounds = array<i64: 128, 128>}, {pipeline_mode = #tpu.pipeline_mode<synchronous>, transform_indices = @transform_9, window_bounds = array<i64: 1, 128>}, {pipeline_mode = #tpu.pipeline_mode<synchronous>, transform_indices = @transform_10, window_bounds = array<i64: 128, 128>}, {pipeline_mode = #tpu.pipeline_mode<synchronous>, transform_indices = @transform_11, window_bounds = array<i64: 1, 128>}, {transform_indices = @transform_12, window_bounds = array<i64: 8, 128>}]} {
    %c0 = arith.constant 0 : index
    %c0_0 = arith.constant 0 : index
    %0 = vector.load %arg1[%c0, %c0_0] : memref<8x24xf32, #tpu.memory_space<vmem>>, vector<8x24xf32>
    %c0_1 = arith.constant 0 : index
    %c0_2 = arith.constant 0 : index
    %1 = vector.load %arg2[%c0_1, %c0_2] : memref<8x1xf32, #tpu.memory_space<vmem>>, vector<8x1xf32>
    %c0_3 = arith.constant 0 : index
    %c0_4 = arith.constant 0 : index
    %2 = vector.load %arg4[%c0_3, %c0_4] : memref<24x128xf32, #tpu.memory_space<vmem>>, vector<24x128xf32>
    %cst = arith.constant dense<0.000000e+00> : vector<8x128xf32>
    %3 = tpu.matmul %0, %2, %cst {dimension_numbers = #tpu.dot_dimension_numbers<[1], [0], [0], [1], [0, 0, 1, 1], [], []>} : vector<8x24xf32>, vector<24x128xf32>, vector<8x128xf32> -> vector<8x128xf32>
    %c0_5 = arith.constant 0 : index
    %c0_6 = arith.constant 0 : index
    %4 = vector.load %arg5[%c0_5, %c0_6] : memref<1x128xf32, #tpu.memory_space<vmem>>, vector<1x128xf32>
    %5 = vector.broadcast %1 : vector<8x1xf32> to vector<8x128xf32>
    %6 = vector.broadcast %4 : vector<1x128xf32> to vector<8x128xf32>
    %7 = arith.mulf %5, %6 : vector<8x128xf32>
    %8 = arith.addf %3, %7 : vector<8x128xf32>
    %c0_7 = arith.constant 0 : index
    %c0_8 = arith.constant 0 : index
    %9 = vector.load %arg6[%c0_7, %c0_8] : memref<1x128xf32, #tpu.memory_space<vmem>>, vector<1x128xf32>
    %10 = vector.broadcast %9 : vector<1x128xf32> to vector<8x128xf32>
    %11 = arith.addf %8, %10 : vector<8x128xf32>
    %12 = arith.negf %11 : vector<8x128xf32>
    %13 = math.exp %12 : vector<8x128xf32>
    %cst_9 = arith.constant 1.000000e+00 : f32
    %14 = vector.broadcast %cst_9 : f32 to vector<8x128xf32>
    %15 = arith.addf %14, %13 : vector<8x128xf32>
    %16 = arith.divf %14, %15 : vector<8x128xf32>
    %17 = arith.mulf %11, %16 : vector<8x128xf32>
    %c0_10 = arith.constant 0 : index
    %c0_11 = arith.constant 0 : index
    %18 = vector.load %arg7[%c0_10, %c0_11] : memref<128x128xf32, #tpu.memory_space<vmem>>, vector<128x128xf32>
    %cst_12 = arith.constant dense<0.000000e+00> : vector<8x128xf32>
    %19 = tpu.matmul %17, %18, %cst_12 {dimension_numbers = #tpu.dot_dimension_numbers<[1], [0], [0], [1], [0, 0, 1, 1], [], []>} : vector<8x128xf32>, vector<128x128xf32>, vector<8x128xf32> -> vector<8x128xf32>
    %c0_13 = arith.constant 0 : index
    %c0_14 = arith.constant 0 : index
    %20 = vector.load %arg8[%c0_13, %c0_14] : memref<1x128xf32, #tpu.memory_space<vmem>>, vector<1x128xf32>
    %21 = vector.broadcast %20 : vector<1x128xf32> to vector<8x128xf32>
    %22 = arith.addf %19, %21 : vector<8x128xf32>
    %23 = arith.negf %22 : vector<8x128xf32>
    %24 = math.exp %23 : vector<8x128xf32>
    %cst_15 = arith.constant 1.000000e+00 : f32
    %25 = vector.broadcast %cst_15 : f32 to vector<8x128xf32>
    %26 = arith.addf %25, %24 : vector<8x128xf32>
    %27 = arith.divf %25, %26 : vector<8x128xf32>
    %28 = arith.mulf %22, %27 : vector<8x128xf32>
    %c0_16 = arith.constant 0 : index
    %c0_17 = arith.constant 0 : index
    %29 = vector.load %arg9[%c0_16, %c0_17] : memref<128x128xf32, #tpu.memory_space<vmem>>, vector<128x128xf32>
    %cst_18 = arith.constant dense<0.000000e+00> : vector<8x128xf32>
    %30 = tpu.matmul %28, %29, %cst_18 {dimension_numbers = #tpu.dot_dimension_numbers<[1], [0], [0], [1], [0, 0, 1, 1], [], []>} : vector<8x128xf32>, vector<128x128xf32>, vector<8x128xf32> -> vector<8x128xf32>
    %c0_19 = arith.constant 0 : index
    %c0_20 = arith.constant 0 : index
    %31 = vector.load %arg10[%c0_19, %c0_20] : memref<1x128xf32, #tpu.memory_space<vmem>>, vector<1x128xf32>
    %32 = vector.broadcast %31 : vector<1x128xf32> to vector<8x128xf32>
    %33 = arith.addf %30, %32 : vector<8x128xf32>
    %34 = arith.negf %33 : vector<8x128xf32>
    %35 = math.exp %34 : vector<8x128xf32>
    %cst_21 = arith.constant 1.000000e+00 : f32
    %36 = vector.broadcast %cst_21 : f32 to vector<8x128xf32>
    %37 = arith.addf %36, %35 : vector<8x128xf32>
    %38 = arith.divf %36, %37 : vector<8x128xf32>
    %39 = arith.mulf %33, %38 : vector<8x128xf32>
    %c0_22 = arith.constant 0 : index
    %c0_23 = arith.constant 0 : index
    %40 = vector.load %arg11[%c0_22, %c0_23] : memref<128x128xf32, #tpu.memory_space<vmem>>, vector<128x128xf32>
    %cst_24 = arith.constant dense<0.000000e+00> : vector<8x128xf32>
    %41 = tpu.matmul %39, %40, %cst_24 {dimension_numbers = #tpu.dot_dimension_numbers<[1], [0], [0], [1], [0, 0, 1, 1], [], []>} : vector<8x128xf32>, vector<128x128xf32>, vector<8x128xf32> -> vector<8x128xf32>
    %c0_25 = arith.constant 0 : index
    %c0_26 = arith.constant 0 : index
    %42 = vector.load %arg12[%c0_25, %c0_26] : memref<1x128xf32, #tpu.memory_space<vmem>>, vector<1x128xf32>
    %43 = vector.broadcast %42 : vector<1x128xf32> to vector<8x128xf32>
    %44 = arith.addf %41, %43 : vector<8x128xf32>
    %c0_27 = arith.constant 0 : index
    %c0_28 = arith.constant 0 : index
    %45 = vector.load %arg3[%c0_27, %c0_28] : memref<24x128xf32, #tpu.memory_space<vmem>>, vector<24x128xf32>
    %cst_29 = arith.constant dense<0.000000e+00> : vector<8x128xf32>
    %46 = tpu.matmul %0, %45, %cst_29 {dimension_numbers = #tpu.dot_dimension_numbers<[1], [0], [0], [1], [0, 0, 1, 1], [], []>} : vector<8x24xf32>, vector<24x128xf32>, vector<8x128xf32> -> vector<8x128xf32>
    %cst_30 = arith.constant 1.000000e+00 : f32
    %47 = vector.broadcast %cst_30 : f32 to vector<8x128xf32>
    %48 = arith.subf %47, %46 : vector<8x128xf32>
    %49 = arith.mulf %48, %44 : vector<8x128xf32>
    %c0_31 = arith.constant 0 : index
    %c0_32 = arith.constant 0 : index
    %50 = vector.load %arg13[%c0_31, %c0_32] : memref<8x128xf32, #tpu.memory_space<vmem>>, vector<8x128xf32>
    tpu.vector_store %arg13[%c0_31, %c0_32], %49 {strides = array<i32>} : memref<8x128xf32, #tpu.memory_space<vmem>>, vector<8x128xf32>,
    return
  }
  func.func @transform_0(%arg0: i32) -> (i32, i32) {
    %c0_i32 = arith.constant 0 : i32
    %c0_i32_0 = arith.constant 0 : i32
    return %arg0, %c0_i32 : i32, i32
  }
  func.func @transform_1(%arg0: i32) -> (i32, i32) {
    %c0_i32 = arith.constant 0 : i32
    %c0_i32_0 = arith.constant 0 : i32
    return %arg0, %c0_i32 : i32, i32
  }
  func.func @transform_2(%arg0: i32) -> (i32, i32) {
    %c0_i32 = arith.constant 0 : i32
    %c0_i32_0 = arith.constant 0 : i32
    %c0_i32_1 = arith.constant 0 : i32
    return %c0_i32, %c0_i32_0 : i32, i32
  }
  func.func @transform_3(%arg0: i32) -> (i32, i32) {
    %c0_i32 = arith.constant 0 : i32
    %c0_i32_0 = arith.constant 0 : i32
    %c0_i32_1 = arith.constant 0 : i32
    return %c0_i32, %c0_i32_0 : i32, i32
  }
  func.func @transform_4(%arg0: i32) -> (i32, i32) {
    %c0_i32 = arith.constant 0 : i32
    %c0_i32_0 = arith.constant 0 : i32
    %c0_i32_1 = arith.constant 0 : i32
    return %c0_i32, %c0_i32_0 : i32, i32
  }
  func.func @transform_5(%arg0: i32) -> (i32, i32) {
    %c0_i32 = arith.constant 0 : i32
    %c0_i32_0 = arith.constant 0 : i32
    %c0_i32_1 = arith.constant 0 : i32
    return %c0_i32, %c0_i32_0 : i32, i32
  }
  func.func @transform_6(%arg0: i32) -> (i32, i32) {
    %c0_i32 = arith.constant 0 : i32
    %c0_i32_0 = arith.constant 0 : i32
    %c0_i32_1 = arith.constant 0 : i32
    return %c0_i32, %c0_i32_0 : i32, i32
  }
  func.func @transform_7(%arg0: i32) -> (i32, i32) {
    %c0_i32 = arith.constant 0 : i32
    %c0_i32_0 = arith.constant 0 : i32
    %c0_i32_1 = arith.constant 0 : i32
    return %c0_i32, %c0_i32_0 : i32, i32
  }
  func.func @transform_8(%arg0: i32) -> (i32, i32) {
    %c0_i32 = arith.constant 0 : i32
    %c0_i32_0 = arith.constant 0 : i32
    %c0_i32_1 = arith.constant 0 : i32
    return %c0_i32, %c0_i32_0 : i32, i32
  }
  func.func @transform_9(%arg0: i32) -> (i32, i32) {
    %c0_i32 = arith.constant 0 : i32
    %c0_i32_0 = arith.constant 0 : i32
    %c0_i32_1 = arith.constant 0 : i32
    return %c0_i32, %c0_i32_0 : i32, i32
  }
  func.func @transform_10(%arg0: i32) -> (i32, i32) {
    %c0_i32 = arith.constant 0 : i32
    %c0_i32_0 = arith.constant 0 : i32
    %c0_i32_1 = arith.constant 0 : i32
    return %c0_i32, %c0_i32_0 : i32, i32
  }
  func.func @transform_11(%arg0: i32) -> (i32, i32) {
    %c0_i32 = arith.constant 0 : i32
    %c0_i32_0 = arith.constant 0 : i32
    %c0_i32_1 = arith.constant 0 : i32
    return %c0_i32, %c0_i32_0 : i32, i32
  }
  func.func @transform_12(%arg0: i32) -> (i32, i32) {
    %c0_i32 = arith.constant 0 : i32
    %c0_i32_0 = arith.constant 0 : i32
    return %arg0, %c0_i32 : i32, i32
  }
}

</mosaic_0001>

<bundles_post_ra>
// kernel: tpu_custom_call.1
= control target key start
LH: loop header
LB: loop body
LE: loop exit
PB: predicated region body
PF: predicated region fallthrough
CT: control target
= control target key end

     0   :  { %17 = vsyncpa [#allocation3], 0  ;;  %s1281_s0 = inlined_call_operand.vmem [shape: f32[8,24], index: 0, kind: input, shape index: {}]   ;;  %s1282_s1 = inlined_call_operand.vmem [shape: f32[8,1], index: 1, kind: input, shape index: {}]   ;;  %s1283_s2 = inlined_call_operand.hbm [shape: f32[24,128], index: 2, kind: input, shape index: {}]   ;;  %s1284_s3 = inlined_call_operand.hbm [shape: f32[24,128], index: 3, kind: input, shape index: {}]   ;;  %s1285_s4 = inlined_call_operand.vmem [shape: f32[1,128], index: 4, kind: input, shape index: {}]   ;;  %s1286_s5 = inlined_call_operand.vmem [shape: f32[1,128], index: 5, kind: input, shape index: {}]   ;;  %s1287_s6 = inlined_call_operand.hbm [shape: f32[128,128], index: 6, kind: input, shape index: {}]   ;;  %s1288_s7 = inlined_call_operand.vmem [shape: f32[1,128], index: 7, kind: input, shape index: {}]   ;;  %s1289_s8 = inlined_call_operand.hbm [shape: f32[128,128], index: 8, kind: input, shape index: {}]   ;;  %s1290_s9 = inlined_call_operand.vmem [shape: f32[1,128], index: 9, kind: input, shape index: {}]   ;;  %s1291_s10 = inlined_call_operand.hbm [shape: f32[128,128], index: 10, kind: input, shape index: {}]   ;;  %s1292_s11 = inlined_call_operand.vmem [shape: f32[1,128], index: 11, kind: input, shape index: {}]   ;;  %s1293_s12 = inlined_call_operand.hbm [shape: f32[8,128], index: 12, kind: output, shape index: {}]  }
   0x1   :  { %18 = vsyncpa [#allocation6], 0 }
   0x2   :  { %19 = vsyncpa [#allocation9], 0 }
   0x3   :  { %20 = vsyncpa [#allocation4], 0  ;;  %s1038_s21 = smov [#allocation5]   ;;  %s1039_s23 = smov [#allocation8]  }
   0x4   :  { %s42_s22 = sshll.u32 %s1038_s21, 4  ;;  %s72_s24 = sshll.u32 %s1039_s23, 4  ;;  %s43_s22 = int_to_ptr.vmem [resolvable:$true] %s42_s22  ;;  %s1115_s24 = int_to_ptr.vmem [resolvable:$true] %s72_s24 }
   0x5   :  { %s898_s27 = scalar_lea.hbm %s1284_s3, 384 }
   0x6   :  { %p899_p0 = scmp.ne.s32.totalorder %s1284_s3, %s898_s27  ;;  %p902_p1 = scmp.lt.u32.totalorder %s898_s27, %s1284_s3 }
   0x8   :  { %p904_p2 = pnand %p902_p1, %p899_p0 }
   0xa   :  { %907 = shalt.err (!%p904_p2)
}
   0xb   :  { %s908_s14 = scalar_lea.vmem %s43_s22, 384  ;;  %p913_p4 = scmp.lt.s32.totalorder %s43_s22, %s43_s22 }
   0xc   :  { %p909_p3 = scmp.ne.s32.totalorder %s43_s22, %s908_s14  ;;  %p914_p5 = scmp.lt.s32.totalorder %s908_s14, %s908_s14 }
   0xe   :  { %p915_p6 = por %p914_p5, %p913_p4 }
  0x10   :  { %p916_p7 = pnand %p915_p6, %p909_p3 }
  0x12   :  { %919 = shalt.err (!%p916_p7)
}
  0x13   :  { %s1040_s15 = smov 128   ;;  %s1041_s16 = smov 8  }
  0x14   :  { %48 = dma.hbm_to_vmem [thread:$0]  %s1284_s3, 384, %s43_s22, [#allocation6], %s1040_s15, %s1040_s15, %s1041_s16  }
  0x15   :  { %s920_s21 = scalar_lea.hbm %s1289_s8, 2048 }
  0x16   :  { %p921_p8 = scmp.ne.s32.totalorder %s1289_s8, %s920_s21  ;;  %p924_p9 = scmp.lt.u32.totalorder %s920_s21, %s1289_s8 }
  0x18   :  { %p926_p10 = pnand %p924_p9, %p921_p8 }
  0x1a   :  { %929 = shalt.err (!%p926_p10)
}
  0x1b   :  { %s930_s28 = scalar_lea.vmem %s1115_s24, 2048  ;;  %p935_p12 = scmp.lt.s32.totalorder %s1115_s24, %s1115_s24 }
  0x1c   :  { %p931_p11 = scmp.ne.s32.totalorder %s1115_s24, %s930_s28  ;;  %p936_p13 = scmp.lt.s32.totalorder %s930_s28, %s930_s28 }
  0x1e   :  { %p937_p0 = por %p936_p13, %p935_p12 }
  0x20   :  { %p938_p1 = pnand %p937_p0, %p931_p11 }
  0x22   :  { %941 = shalt.err (!%p938_p1)
}
  0x23   :  { %78 = dma.hbm_to_vmem [thread:$0]  %s1289_s8, 2048, %s1115_s24, [#allocation9], %s1040_s15, %s1040_s15, %s1041_s16  }
  0x24   :  { %s1042_s29 = smov [#allocation2]   ;;  %s1043_s13 = smov [#allocation7]  }
  0x25   :  { %s30_s30 = sshll.u32 %s1042_s29, 4  ;;  %s58_s14 = sshll.u32 %s1043_s13, 4  ;;  %s31_s30 = int_to_ptr.vmem [resolvable:$true] %s30_s30  ;;  %s1152_s14 = int_to_ptr.vmem [resolvable:$true] %s58_s14 }
  0x26   :  { %s942_s19 = scalar_lea.hbm %s1283_s2, 384 }
  0x27   :  { %p943_p2 = scmp.ne.s32.totalorder %s1283_s2, %s942_s19  ;;  %p946_p3 = scmp.lt.u32.totalorder %s942_s19, %s1283_s2 }
  0x29   :  { %p948_p4 = pnand %p946_p3, %p943_p2 }
  0x2b   :  { %951 = shalt.err (!%p948_p4)
}
  0x2c   :  { %s952_s8 = scalar_lea.vmem %s31_s30, 384  ;;  %p957_p6 = scmp.lt.s32.totalorder %s31_s30, %s31_s30 }
  0x2d   :  { %p953_p5 = scmp.ne.s32.totalorder %s31_s30, %s952_s8  ;;  %p958_p7 = scmp.lt.s32.totalorder %s952_s8, %s952_s8 }
  0x2f   :  { %p959_p8 = por %p958_p7, %p957_p6 }
  0x31   :  { %p960_p9 = pnand %p959_p8, %p953_p5 }
  0x33   :  { %963 = shalt.err (!%p960_p9)
}
  0x34   :  { %36 = dma.hbm_to_vmem [thread:$0]  %s1283_s2, 384, %s31_s30, [#allocation3], %s1040_s15, %s1040_s15, %s1041_s16  }
  0x35   :  { %s964_s3 = scalar_lea.hbm %s1287_s6, 2048 }
  0x36   :  { %p965_p10 = scmp.ne.s32.totalorder %s1287_s6, %s964_s3  ;;  %p968_p11 = scmp.lt.u32.totalorder %s964_s3, %s1287_s6 }
  0x38   :  { %p970_p12 = pnand %p968_p11, %p965_p10 }
  0x3a   :  { %973 = shalt.err (!%p970_p12)
}
  0x3b   :  { %s974_s18 = scalar_lea.vmem %s1152_s14, 2048  ;;  %p979_p0 = scmp.lt.s32.totalorder %s1152_s14, %s1152_s14 }
  0x3c   :  { %p975_p13 = scmp.ne.s32.totalorder %s1152_s14, %s974_s18  ;;  %p980_p1 = scmp.lt.s32.totalorder %s974_s18, %s974_s18 }
  0x3e   :  { %p981_p2 = por %p980_p1, %p979_p0 }
  0x40   :  { %p982_p3 = pnand %p981_p2, %p975_p13 }
  0x42   :  { %985 = shalt.err (!%p982_p3)
}
  0x43   :  { %64 = dma.hbm_to_vmem [thread:$0]  %s1287_s6, 2048, %s1152_s14, [#allocation6], %s1040_s15, %s1040_s15, %s1041_s16  }
  0x44   :  { %s1044_s19 = smov [#allocation10]   ;;  %s986_s25 = scalar_lea.hbm %s1291_s10, 2048 }
  0x45   :  { %s86_s20 = sshll.u32 %s1044_s19, 4  ;;  %p987_p4 = scmp.ne.s32.totalorder %s1291_s10, %s986_s25  ;;  %s87_s20 = int_to_ptr.vmem [resolvable:$true] %s86_s20 }
  0x46   :  { %p990_p5 = scmp.lt.u32.totalorder %s986_s25, %s1291_s10 }
  0x48   :  { %p992_p6 = pnand %p990_p5, %p987_p4 }
  0x4a   :  { %995 = shalt.err (!%p992_p6)
}
  0x4b   :  { %s996_s28 = scalar_lea.vmem %s87_s20, 2048  ;;  %p1001_p8 = scmp.lt.s32.totalorder %s87_s20, %s87_s20 }
  0x4c   :  { %p997_p7 = scmp.ne.s32.totalorder %s87_s20, %s996_s28  ;;  %p1002_p9 = scmp.lt.s32.totalorder %s996_s28, %s996_s28 }
  0x4e   :  { %p1003_p10 = por %p1002_p9, %p1001_p8 }
  0x50   :  { %p1004_p11 = pnand %p1003_p10, %p997_p7 }
  0x52   :  { %1007 = shalt.err (!%p1004_p11)
}
  0x53   :  { %92 = dma.hbm_to_vmem [thread:$0]  %s1291_s10, 2048, %s87_s20, [#allocation9], %s1040_s15, %s1040_s15, %s1041_s16  }
  0x54   :  { %1030 = dma.done.wait [#allocation3], 384  }
  0x55   :  { %1031 = vsyncadd [#allocation3], 4294966912 }
  0x56   :  { %1032 = dma.done.wait [#allocation6], 2432  }
  0x57   :  { %1033 = vsyncadd [#allocation6], 4294964864 }
  0x58   :  { %1034 = dma.done.wait [#allocation9], 4096  }
  0x59   :  { %1035 = vsyncadd [#allocation9], 4294963200  ;;  %v1045_v0 = vmov 0.0|0.0   ;;  %vm1046_vm0 = vmmov 0   ;;  %v1047_v1 = vmov 0.0   ;;  %v1048_v2 = vmov 0  }
  0x5a   :  { %795 = vmatprep.subr.bf16.mxu0 %v1045_v0  ;;  %678 = vmatprep.mubr.msk.f32.mxu0 %vm1046_vm0, %v1047_v1  ;;  %v112_v3 = vld [vmem:[#allocation5] sm:$0xff]  ;;  %v113_v4 = vld [vmem:[#allocation5 + $0x8] sm:$0xff]  ;;  %v114_v7 = vld [vmem:[#allocation5 + $0x10] sm:$0xff]  ;;  %vm128_vm1 = vcmask 195584  }
  0x5b   :  { %885 = vset.pattern.permute.xlu0 %v1048_v2  ;;  %798 = vmatprep.subr.bf16.mxu1 %v1045_v0  ;;  %v796_v5 = vpack.c.bf16 %v113_v4, %v112_v3  ;;  %v111_v6 = vld [vmem:[%s1282_s1] sm:$0xff]  ;;  %v217_v9 = vld [vmem:[#allocation7] sm:$0xff]  ;;  %v218_v10 = vld [vmem:[#allocation7 + $0x8] sm:$0xff] }
  0x5c   :  { %713 = vmatprep.mubr.msk.f32.mxu1 %vm1046_vm0, %v1047_v1  ;;  %118 = vperm.xlu0 %885, %v111_v6   ;;  %v1217_v8 = vld [vmem:[%s1281_s0] sm:$0xff]  ;;  %v799_v11 = vpack.c.bf16 %v218_v10, %v217_v9  ;;  %v220_v13 = vld [vmem:[#allocation7 + $0x18] sm:$0xff]  ;;  %v221_v15 = vld [vmem:[#allocation7 + $0x20] sm:$0xff] }
  0x5d   :  { %797 = vmatpush3.bf16.msra.mxu0 %v796_v5  ;;  %v219_v12 = vld [vmem:[#allocation7 + $0x10] sm:$0xff]  ;;  %v222_v16 = vld [vmem:[#allocation7 + $0x28] sm:$0xff]  ;;  %v224_v19 = vld [vmem:[#allocation7 + $0x38] sm:$0xff] }
  0x5e   :  { %676 = vmatprep.subr.mxu0 %v1047_v1  ;;  %800 = vmatpush3.bf16.msra.mxu1 %v799_v11  ;;  %v802_v14 = vpack.c.bf16 %v220_v13, %v219_v12  ;;  %v805_v17 = vpack.c.bf16 %v222_v16, %v221_v15  ;;  %v223_v18 = vld [vmem:[#allocation7 + $0x30] sm:$0xff]  ;;  %v225_v21 = vld [vmem:[#allocation7 + $0x40] sm:$0xff]  ;;  %v226_v22 = vld [vmem:[#allocation7 + $0x48] sm:$0xff] }
  0x5f   :  { %801 = vmatprep.subr.bf16.mxu1 %v1045_v0  ;;  %v808_v20 = vpack.c.bf16 %v224_v19, %v223_v18  ;;  %v811_v23 = vpack.c.bf16 %v226_v22, %v225_v21  ;;  %v227_v24 = vld [vmem:[#allocation7 + $0x50] sm:$0xff]  ;;  %v228_v25 = vld [vmem:[#allocation7 + $0x58] sm:$0xff]  ;;  %v229_v27 = vld [vmem:[#allocation7 + $0x60] sm:$0xff] }
  0x60   :  { %v814_v26 = vpack.c.bf16 %v228_v25, %v227_v24  ;;  %v230_v28 = vld [vmem:[#allocation7 + $0x68] sm:$0xff]  ;;  %v231_v30 = vld [vmem:[#allocation7 + $0x70] sm:$0xff]  ;;  %v232_v31 = vld [vmem:[#allocation7 + $0x78] sm:$0xff] }
  0x61   :  { %677 = vmatpush3.msra.mxu0 %v114_v7  ;;  %v817_v29 = vpack.c.bf16 %v230_v28, %v229_v27  ;;  %v820_v32 = vpack.c.bf16 %v232_v31, %v231_v30  ;;  %v603_v33 = vld [vmem:[%s1285_s4] ss:$0 sm:$0xff]  ;;  %v317_v46 = vld [vmem:[#allocation8] sm:$0xff]  ;;  %v318_v47 = vld [vmem:[#allocation8 + $0x8] sm:$0xff] }
  0x62   :  { %679 = vmatmul.mubr.msk.f32.vlgmr.msra.gmra.mrb[0].mxu0 %vm128_vm1, %v1217_v8  ;;  %822 = vmatprep.subr.bf16.mxu0 %v1045_v0  ;;  %v605_v37 = vld [vmem:[%s1286_s5] ss:$0 sm:$0xff]  ;;  %v823_v48 = vpack.c.bf16 %v318_v47, %v317_v46  ;;  %v320_v50 = vld [vmem:[#allocation8 + $0x18] sm:$0xff]  ;;  %v321_v52 = vld [vmem:[#allocation8 + $0x20] sm:$0xff] }
  0x63   :  { %748 = vmatprep.mubr.msk.f32.mxu0 %vm1046_vm0, %v1047_v1  ;;  %803 = vmatpush3.bf16.msra.mxu1 %v802_v14  ;;  %v319_v49 = vld [vmem:[#allocation8 + $0x10] sm:$0xff]  ;;  %v322_v53 = vld [vmem:[#allocation8 + $0x28] sm:$0xff]  ;;  %v324_v56 = vld [vmem:[#allocation8 + $0x38] sm:$0xff] }
  0x64   :  { %804 = vmatprep.subr.bf16.mxu1 %v1045_v0  ;;  %824 = vmatpush3.bf16.msra.mxu0 %v823_v48  ;;  %v826_v51 = vpack.c.bf16 %v320_v50, %v319_v49  ;;  %v829_v54 = vpack.c.bf16 %v322_v53, %v321_v52  ;;  %v323_v55 = vld [vmem:[#allocation8 + $0x30] sm:$0xff]  ;;  %v325_v58 = vld [vmem:[#allocation8 + $0x40] sm:$0xff]  ;;  %v326_v59 = vld [vmem:[#allocation8 + $0x48] sm:$0xff] }
  0x65   :  { %825 = vmatprep.subr.bf16.mxu0 %v1045_v0  ;;  %v832_v57 = vpack.c.bf16 %v324_v56, %v323_v55  ;;  %v835_v60 = vpack.c.bf16 %v326_v59, %v325_v58  ;;  %v327_v61 = vld [vmem:[#allocation8 + $0x50] sm:$0xff]  ;;  %v328_v62 = vld [vmem:[#allocation8 + $0x58] sm:$0xff]  ;;  %v329_v2 = vld [vmem:[#allocation8 + $0x60] sm:$0xff] }
  0x66   :  { %v838_v63 = vpack.c.bf16 %v328_v62, %v327_v61  ;;  %v330_v3 = vld [vmem:[#allocation8 + $0x68] sm:$0xff]  ;;  %v331_v5 = vld [vmem:[#allocation8 + $0x70] sm:$0xff]  ;;  %v332_v6 = vld [vmem:[#allocation8 + $0x78] sm:$0xff] }
  0x67   :  { %806 = vmatpush3.bf16.msra.mxu1 %v805_v17  ;;  %v841_v4 = vpack.c.bf16 %v330_v3, %v329_v2  ;;  %v844_v7 = vpack.c.bf16 %v332_v6, %v331_v5  ;;  %v607_v9 = vld [vmem:[%s1288_s7] ss:$0 sm:$0xff]  ;;  %v417_v18 = vld [vmem:[#allocation10] sm:$0xff]  ;;  %v418_v19 = vld [vmem:[#allocation10 + $0x8] sm:$0xff] }
  0x68   :  { %807 = vmatprep.subr.bf16.mxu1 %v1045_v0  ;;  %827 = vmatpush3.bf16.msra.mxu0 %v826_v51  ;;  %v419_v21 = vld [vmem:[#allocation10 + $0x10] sm:$0xff]  ;;  %v420_v22 = vld [vmem:[#allocation10 + $0x18] sm:$0xff]  ;;  %v421_v24 = vld [vmem:[#allocation10 + $0x20] sm:$0xff] }
  0x69   :  { %828 = vmatprep.subr.bf16.mxu0 %v1045_v0  ;;  %v422_v25 = vld [vmem:[#allocation10 + $0x28] sm:$0xff]  ;;  %v423_v27 = vld [vmem:[#allocation10 + $0x30] sm:$0xff]  ;;  %v424_v28 = vld [vmem:[#allocation10 + $0x38] sm:$0xff] }
  0x6a   :  { %v425_v30 = vld [vmem:[#allocation10 + $0x40] sm:$0xff]  ;;  %v426_v31 = vld [vmem:[#allocation10 + $0x48] sm:$0xff]  ;;  %v609_v46 = vld [vmem:[%s1290_s9] ss:$0 sm:$0xff]  ;;  %s1049_s9 = smov [#allocation11]  }
  0x6b   :  { %809 = vmatpush3.bf16.msra.mxu1 %v808_v20  ;;  %v847_v20 = vpack.c.bf16 %v418_v19, %v417_v18  ;;  %s592_s2 = sshll.u32 %s1049_s9, 4  ;;  %s593_s2 = int_to_ptr.vmem [resolvable:$true] %s592_s2 }
  0x6c   :  { %810 = vmatprep.subr.bf16.mxu1 %v1045_v0  ;;  %830 = vmatpush3.bf16.msra.mxu0 %v829_v54  ;;  %s1008_s30 = scalar_lea.vmem %s593_s2, 128  ;;  %p1013_p13 = scmp.lt.s32.totalorder %s593_s2, %s593_s2 }
  0x6d   :  { %831 = vmatprep.subr.bf16.mxu0 %v1045_v0  ;;  %p1009_p12 = scmp.ne.s32.totalorder %s593_s2, %s1008_s30  ;;  %p1014_p0 = scmp.lt.s32.totalorder %s1008_s30, %s1008_s30 }
  0x6f   :  { %812 = vmatpush3.bf16.msra.mxu1 %v811_v23  ;;  %v850_v23 = vpack.c.bf16 %v420_v22, %v419_v21  ;;  %p1015_p1 = por %p1014_p0, %p1013_p13 }
  0x70   :  { %813 = vmatprep.subr.bf16.mxu1 %v1045_v0  ;;  %833 = vmatpush3.bf16.msra.mxu0 %v832_v57 }
  0x71   :  { %834 = vmatprep.subr.bf16.mxu0 %v1045_v0  ;;  %p1016_p2 = pnand %p1015_p1, %p1009_p12 }
  0x73   :  { %815 = vmatpush3.bf16.msra.mxu1 %v814_v26  ;;  %v853_v26 = vpack.c.bf16 %v422_v25, %v421_v24 }
  0x74   :  { %816 = vmatprep.subr.bf16.mxu1 %v1045_v0  ;;  %836 = vmatpush3.bf16.msra.mxu0 %v835_v60 }
  0x75   :  { %837 = vmatprep.subr.bf16.mxu0 %v1045_v0 }
  0x77   :  { %818 = vmatpush3.bf16.msra.mxu1 %v817_v29  ;;  %v856_v29 = vpack.c.bf16 %v424_v28, %v423_v27 }
  0x78   :  { %819 = vmatprep.subr.bf16.mxu1 %v1045_v0  ;;  %839 = vmatpush3.bf16.msra.mxu0 %v838_v63 }
  0x79   :  { %840 = vmatprep.subr.bf16.mxu0 %v1045_v0 }
  0x7b   :  { %821 = vmatpush3.bf16.msra.mxu1 %v820_v32  ;;  %v859_v32 = vpack.c.bf16 %v426_v31, %v425_v30 }
  0x7c   :  { %846 = vmatprep.subr.bf16.mxu1 %v1045_v0  ;;  %842 = vmatpush3.bf16.msra.mxu0 %v841_v4 }
  0x7d   :  { %843 = vmatprep.subr.bf16.mxu0 %v1045_v0 }
  0x80   :  { %845 = vmatpush3.bf16.msra.mxu0 %v844_v7 }
  0x81   :  { %870 = vmatprep.subr.bf16.mxu0 %v1045_v0 }
  0xdb   :  { %v119_v34 = vpop.permute.xlu0 %118 }
  0xdc   :  { %v127_v35 = vmul.f32 %v603_v33, %v119_v34  ;;  %v427_v33 = vld [vmem:[#allocation10 + $0x50] sm:$0xff]  ;;  %v428_v34 = vld [vmem:[#allocation10 + $0x58] sm:$0xff] }
 0x135   :  { %v198_v36 = vpop.f32.mrb[0].mxu0 }
 0x136   :  { %v199_v38 = vadd.f32 %v198_v36, %v127_v35  ;;  %v680_v39 = vpop.f32.mrb[1].mxu0  ;;  %v862_v35 = vpack.c.bf16 %v428_v34, %v427_v33  ;;  %v429_v36 = vld [vmem:[#allocation10 + $0x60] sm:$0xff] }
 0x137   :  { %v510_v39 = vld [vmem:[#allocation2] sm:$0xff] }
 0x138   :  { %v209_v40 = vadd.f32 %v605_v37, %v199_v38  ;;  %v430_v37 = vld [vmem:[#allocation10 + $0x68] sm:$0xff] }
 0x139   :  { %v865_v38 = vpack.c.bf16 %v430_v37, %v429_v36 }
 0x13a   :  { %v606_v41 = vmul.f32 -1.442695, %v209_v40 }
 0x13c   :  { %886 = vpow2.f32 %v606_v41 }
 0x146   :  { %v887_v42 = vpop.eup %886 }
 0x147   :  { %v213_v43 = vadd.f32 1.0, %v887_v42  ;;  %v431_v42 = vld [vmem:[#allocation10 + $0x70] sm:$0xff] }
 0x149   :  { %888 = vrcp.f32 %v213_v43  ;;  %v432_v43 = vld [vmem:[#allocation10 + $0x78] sm:$0xff] }
 0x153   :  { %v889_v44 = vpop.eup %888 }
 0x154   :  { %v216_v45 = vmul.f32 %v889_v44, %v209_v40  ;;  %v511_v40 = vld [vmem:[#allocation2 + $0x8] sm:$0xff]  ;;  %v868_v44 = vpack.c.bf16 %v432_v43, %v431_v42 }
 0x155   :  { %v871_v41 = vpack.c.bf16 %v511_v40, %v510_v39 }
 0x156   :  { %714 = vmatmul.mubr.f32.vlgmr.msra.gmra.mrb[0].mxu1 %v216_v45  ;;  %v512_v45 = vld [vmem:[#allocation2 + $0x10] sm:$0xff] }
 0x157   :  { %783 = vmatprep.mubr.msk.f32.mxu1 %vm1046_vm0, %v1047_v1  ;;  %848 = vmatpush3.bf16.msra.mxu1 %v847_v20 }
 0x158   :  { %849 = vmatprep.subr.bf16.mxu1 %v1045_v0 }
 0x15b   :  { %851 = vmatpush3.bf16.msra.mxu1 %v850_v23 }
 0x15c   :  { %852 = vmatprep.subr.bf16.mxu1 %v1045_v0 }
 0x15f   :  { %854 = vmatpush3.bf16.msra.mxu1 %v853_v26 }
 0x160   :  { %855 = vmatprep.subr.bf16.mxu1 %v1045_v0 }
 0x163   :  { %857 = vmatpush3.bf16.msra.mxu1 %v856_v29 }
 0x164   :  { %858 = vmatprep.subr.bf16.mxu1 %v1045_v0 }
 0x167   :  { %860 = vmatpush3.bf16.msra.mxu1 %v859_v32 }
 0x168   :  { %861 = vmatprep.subr.bf16.mxu1 %v1045_v0 }
 0x16b   :  { %863 = vmatpush3.bf16.msra.mxu1 %v862_v35 }
 0x16c   :  { %864 = vmatprep.subr.bf16.mxu1 %v1045_v0 }
 0x16f   :  { %866 = vmatpush3.bf16.msra.mxu1 %v865_v38 }
 0x170   :  { %867 = vmatprep.subr.bf16.mxu1 %v1045_v0 }
 0x173   :  { %869 = vmatpush3.bf16.msra.mxu1 %v868_v44 }
 0x229   :  { %v306_v10 = vpop.f32.mrb[0].mxu1 }
 0x22a   :  { %v307_v11 = vadd.f32 %v607_v9, %v306_v10  ;;  %v715_v12 = vpop.f32.mrb[1].mxu1 }
 0x22c   :  { %v608_v13 = vmul.f32 -1.442695, %v307_v11 }
 0x22e   :  { %890 = vpow2.f32 %v608_v13 }
 0x238   :  { %v891_v14 = vpop.eup %890 }
 0x239   :  { %v313_v15 = vadd.f32 1.0, %v891_v14 }
 0x23b   :  { %892 = vrcp.f32 %v313_v15 }
 0x245   :  { %v893_v16 = vpop.eup %892 }
 0x246   :  { %v316_v17 = vmul.f32 %v893_v16, %v307_v11 }
 0x248   :  { %749 = vmatmul.mubr.f32.vlgmr.msra.gmra.mrb[2].mxu0 %v316_v17 }
 0x249   :  { %792 = vmatprep.mubr.msk.f32.mxu0 %vm1046_vm0, %v1047_v1  ;;  %872 = vmatpush3.bf16.msra.mxu0 %v871_v41 }
 0x24a   :  { %790 = vmatprep.subr.mxu0 %v1047_v1 }
 0x24d   :  { %791 = vmatpush3.msra.mxu0 %v512_v45 }
 0x24e   :  { %793 = vmatmul.mubr.msk.f32.vlgmr.msra.gmra.mrb[4].mxu0 %vm128_vm1, %v1217_v8  ;;  %v611_v8 = vld [vmem:[%s1292_s11] ss:$0 sm:$0xff] }
 0x31b   :  { %v406_v47 = vpop.f32.mrb[2].mxu0 }
 0x31c   :  { %v407_v48 = vadd.f32 %v609_v46, %v406_v47  ;;  %v750_v49 = vpop.f32.mrb[3].mxu0 }
 0x31e   :  { %v610_v50 = vmul.f32 -1.442695, %v407_v48 }
 0x320   :  { %894 = vpow2.f32 %v610_v50 }
 0x321   :  { %v579_v53 = vpop.f32.mrb[4].mxu0 }
 0x322   :  { %v794_v54 = vpop.f32.mrb[5].mxu0  ;;  %v583_v55 = vsub.f32 1.0, %v579_v53 }
 0x32a   :  { %v895_v0 = vpop.eup %894 }
 0x32b   :  { %v413_v51 = vadd.f32 1.0, %v895_v0 }
 0x32d   :  { %896 = vrcp.f32 %v413_v51 }
 0x337   :  { %v897_v52 = vpop.eup %896 }
 0x338   :  { %v416_v1 = vmul.f32 %v897_v52, %v407_v48 }
 0x33a   :  { %784 = vmatmul.mubr.f32.vlgmr.msra.gmra.mrb[2].mxu1 %v416_v1 }
 0x40d   :  { %v506_v56 = vpop.f32.mrb[2].mxu1 }
 0x40e   :  { %v507_v57 = vadd.f32 %v611_v8, %v506_v56  ;;  %v785_v58 = vpop.f32.mrb[3].mxu1 }
 0x410   :  { %v584_v59 = vmul.f32 %v583_v55, %v507_v57 }
 0x412   :  { %585 = vst [vmem:[#allocation11] sm:$0xff] %v584_v59 }
 0x413   :  { %1019 = shalt.err (!%p1016_p2)
}
 0x414   :  { %s1020_s11 = scalar_lea.hbm %s1293_s12, 128 }
 0x415   :  { %p1021_p3 = scmp.ne.s32.totalorder %s1293_s12, %s1020_s11  ;;  %p1024_p4 = scmp.lt.u32.totalorder %s1020_s11, %s1293_s12 }
 0x417   :  { %p1026_p5 = pnand %p1024_p4, %p1021_p3 }
 0x419   :  { %1029 = shalt.err (!%p1026_p5)
}
 0x41a   :  { %595 = dma.vmem_to_hbm [thread:$0]  %s593_s2, 128, %s1293_s12, [#allocation4]  }
 0x41b   :  { %1036 = dma.done.wait [#allocation4], 128  }
 0x41c   :  { %1037 = vsyncadd [#allocation4], 4294967168 }
 0x41d   :  { %599 = vsyncpa [#allocation3], 1 }
 0x41e   :  { %600 = vsyncpa [#allocation6], 1 }
 0x41f   :  { %601 = vsyncpa [#allocation9], 1 }
 0x420   :  { %602 = vsyncpa [#allocation4], 1 }

</bundles_post_ra>
